<compile_context>
chip_gen: v5e
topology: v5e:2x2
jax: 0.10.0
libtpu: 0.0.40
codegen_flags: <defaults>
</compile_context>

<pallas_src>
import math

import jax
import jax.numpy as jnp
from jax.experimental import pallas as pl
from jax.experimental.pallas import tpu as pltpu


# ---------------------------------------------------------------------------
# Kernel
# ---------------------------------------------------------------------------

def _linear_relu_emb_kernel(x_ref, e_ref, w_ref, b_ref, o_ref):
    # x_ref: (1, TB, FT)        batch tile of FT feature columns
    # e_ref: (FT, FT*D)         one-hot expansion, VMEM-resident
    # w_ref, b_ref: (1, FT*D)   flattened (feature, embedding) parameter tiles
    # o_ref: (TB, FT*D)         lane-dense output tile
    x = x_ref[0].astype(e_ref.dtype)
    # xb[b, f*D + d] = x[b, f]  (per-feature broadcast done on the MXU)
    xb = jnp.dot(x, e_ref[...], preferred_element_type=jnp.float32)
    w = w_ref[...].astype(jnp.float32)
    b = b_ref[...].astype(jnp.float32)
    o_ref[...] = jnp.maximum(b + w * xb, 0.0).astype(o_ref.dtype)


# ---------------------------------------------------------------------------
# Tiling / budgeting helpers
# ---------------------------------------------------------------------------

def _vmem_plan():
    """Generation-aware VMEM limit + target tile size."""
    cap = None
    try:
        cap = getattr(pltpu.get_tpu_info(), "vmem_capacity_bytes", None)
    except Exception:
        cap = None
    if not cap or cap <= 0:
        cap = 64 << 20                       # conservative: v7x per-TC VMEM
    cap = int(cap)
    vmem_limit = min(cap * 3 // 4, 96 << 20)
    # Smaller tiles on v7x (64 MiB VMEM, high HBM BW), bigger on v5e/v6e.
    target_tile = (4 << 20) if cap <= (64 << 20) else (8 << 20)
    return vmem_limit, target_tile


def _choose_f_tile(F, D, e_itemsize,
                   single_max_lanes=2048, single_max_e_bytes=2 << 20,
                   tiled_target_lanes=1024, tiled_max_e_bytes=2 << 20):
    """Feature tile f_tile: f_tile*D % 128 == 0 (lane-dense stores) and the
    (f_tile, f_tile*D) one-hot expansion matrix stays small & VMEM-resident."""
    base = 128 // math.gcd(D, 128)           # smallest lane-dense feature tile
    f_cover = pl.cdiv(F, base) * base        # covers all features in one tile
    if (f_cover * D <= single_max_lanes
            and f_cover * f_cover * D * e_itemsize <= single_max_e_bytes):
        return f_cover, f_cover               # single feature tile (common case)
    # Tiled: f_tile = f_cover / k (still a multiple of base), lanes near target.
    best = base
    m = f_cover // base
    for k in range(1, m + 1):
        if m % k:
            continue
        ft = f_cover // k
        if ft * ft * D * e_itemsize > tiled_max_e_bytes:
            continue
        if abs(ft * D - tiled_target_lanes) < abs(best * D - tiled_target_lanes):
            best = ft
    return best, f_cover


def _choose_block_batch(B, f_tile, lanes, out_itemsize, x_itemsize,
                        target_tile_bytes, row_align, min_steps=4):
    """Batch tile from the padded, double-buffered VMEM footprint, capped so
    the batch axis has >= min_steps grid steps whenever B allows it."""
    out_row = lanes * out_itemsize                        # lanes % 128 == 0
    x_row = pl.cdiv(f_tile, 128) * 128 * x_itemsize       # lane-padded x row
    per_row = 2 * (out_row + x_row)                       # 2-deep pipeline bufs
    tb = max(int(target_tile_bytes) // per_row, row_align)
    tb -= tb % row_align
    if B >= min_steps * row_align:
        cap = (B // min_steps) - (B // min_steps) % row_align
        tb = min(tb, max(cap, row_align))
    return max(min(tb, B), 1)


# ---------------------------------------------------------------------------
# Wrapper
# ---------------------------------------------------------------------------

def linear_relu_embeddings(x, weight, bias, *, block_batch=None, out_dtype=None,
                           min_pallas_rows=64, force_pallas=False,
                           interpret=False):
    """Pallas TPU implementation of LinearReLUEmbeddings.forward.

    x: (*, F) ; weight, bias: (F, D)  ->  (*, F, D)
    out[..., f, d] = relu(bias[f, d] + weight[f, d] * x[..., f])
    """
    F, D = weight.shape
    if bias.shape != (F, D):
        raise ValueError(f"bias shape {bias.shape} must match weight {weight.shape}")
    if x.ndim < 1:
        raise ValueError("The input must have at least one dimension")
    if x.shape[-1] != F:
        raise ValueError(f"last dimension of x must be {F}, got shape {x.shape}")
    out_dtype = jnp.dtype(x.dtype if out_dtype is None else out_dtype)

    lead = x.shape[:-1]
    B = int(math.prod(lead)) if lead else 1
    x2 = x.reshape(B, F)

    # Tiny problems: pallas_call fixed overhead dwarfs the useful work.
    if not force_pallas and B < min_pallas_rows:
        y = jnp.maximum(bias.astype(jnp.float32)[None]
                        + weight.astype(jnp.float32)[None]
                        * x2.astype(jnp.float32)[..., None], 0.0)
        return y.astype(out_dtype).reshape(*lead, F, D)

    # Expansion matrix dtype: keep bf16 x on the native bf16 MXU path (exact).
    e_dtype = jnp.bfloat16 if x.dtype == jnp.bfloat16 else jnp.float32

    f_tile, F_pad = _choose_f_tile(F, D, jnp.dtype(e_dtype).itemsize)
    num_f = F_pad // f_tile
    lanes = f_tile * D                                    # multiple of 128

    vmem_limit, target_tile = _vmem_plan()
    out_itemsize = out_dtype.itemsize
    row_align = max(8, 32 // out_itemsize)                # 8 f32 / 16 bf16 / 32 int8
    if block_batch is not None:
        tb = max(1, min(int(block_batch), B))
        if tb < B:
            tb = min(B, max(row_align, tb - tb % row_align))
    else:
        tb = _choose_block_batch(B, f_tile, lanes, out_itemsize,
                                 jnp.dtype(x.dtype).itemsize,
                                 target_tile, row_align)
    num_b = pl.cdiv(B, tb)

    # Pad the feature axis (x is only ~1/D of total traffic) and regroup the
    # features as (num_f, B, f_tile) so every block is a legal (8,128) tile.
    if F_pad != F:
        x2 = jnp.pad(x2, ((0, 0), (0, F_pad - F)))
        weight = jnp.pad(weight, ((0, F_pad - F), (0, 0)))
        bias = jnp.pad(bias, ((0, F_pad - F), (0, 0)))
    if num_f == 1:
        x3 = x2.reshape(1, B, f_tile)
    else:
        x3 = jnp.transpose(x2.reshape(B, num_f, f_tile), (1, 0, 2))
    w_flat = weight.reshape(1, F_pad * D)
    b_flat = bias.reshape(1, F_pad * D)

    # One-hot expansion: E[f, f*D + d] = 1, identical for every feature tile.
    col_feat = jnp.arange(lanes, dtype=jnp.int32) // D
    expand = (col_feat[None, :]
              == jnp.arange(f_tile, dtype=jnp.int32)[:, None]).astype(e_dtype)

    cparams = pltpu.CompilerParams(
        dimension_semantics=("parallel", "parallel"),
        vmem_limit_bytes=vmem_limit,
    )

    out = pl.pallas_call(
        _linear_relu_emb_kernel,
        out_shape=jax.ShapeDtypeStruct((B, F * D), out_dtype),
        grid=(num_b, num_f),
        in_specs=[
            pl.BlockSpec((1, tb, f_tile), lambda i, j: (j, i, 0)),
            pl.BlockSpec((f_tile, lanes), lambda i, j: (0, 0)),   # VMEM-resident
            pl.BlockSpec((1, lanes), lambda i, j: (0, j)),
            pl.BlockSpec((1, lanes), lambda i, j: (0, j)),
        ],
        out_specs=pl.BlockSpec((tb, lanes), lambda i, j: (i, j)),
        compiler_params=cparams,
        interpret=interpret,
    )(x3, expand, w_flat, b_flat)
    return out.reshape(*lead, F, D)


def reference(x, weight, bias):
    xf = x.astype(jnp.float32)
    return jnp.maximum(bias.astype(jnp.float32)
                       + weight.astype(jnp.float32) * xf[..., None], 0.0)


# ---------------------------------------------------------------------------
# Demo / self-check
# ---------------------------------------------------------------------------

if __name__ == "__main__":
    key = jax.random.PRNGKey(0)
    k1, k2, k3, k4, k5, k6, k7 = jax.random.split(key, 7)

    def init_params(kw, kb, n_features, d_embedding, dtype=jnp.float32):
        # Mirrors LinearEmbeddings.reset_parameters(): U(-d^-0.5, d^-0.5).
        d_rsqrt = d_embedding ** (-0.5)
        w = jax.random.uniform(kw, (n_features, d_embedding), jnp.float32,
                               minval=-d_rsqrt, maxval=d_rsqrt).astype(dtype)
        b = jax.random.uniform(kb, (n_features, d_embedding), jnp.float32,
                               minval=-d_rsqrt, maxval=d_rsqrt).astype(dtype)
        return w, b

    # --- A: docstring shape (batch=2, n_features=3, d_embedding=32) ---------
    F_a, D_a = 3, 32
    w_a, b_a = init_params(k1, k2, F_a, D_a)
    x_a = jax.random.normal(k3, (2, F_a), jnp.float32)
    out_a = jax.block_until_ready(
        linear_relu_embeddings(x_a, w_a, b_a, force_pallas=True))
    assert out_a.shape == (2, F_a, D_a)
    assert jnp.allclose(out_a, reference(x_a, w_a, b_a), atol=1e-6, rtol=1e-6)

    # --- B: batch-tiled path with >= 4 grid steps (B=512, F=8, D=32) --------
    F_b, D_b = 8, 32
    w_b, b_b = init_params(k4, k5, F_b, D_b)
    x_b = jax.random.normal(k3, (512, F_b), jnp.float32)
    out_b = jax.block_until_ready(linear_relu_embeddings(x_b, w_b, b_b))
    assert out_b.shape == (512, F_b, D_b)
    assert jnp.allclose(out_b, reference(x_b, w_b, b_b), atol=1e-5, rtol=1e-5)

    # --- C: extra leading dims ----------------------------------------------
    x_c = jax.random.normal(k3, (4, 5, F_a), jnp.float32)
    out_c = jax.block_until_ready(
        linear_relu_embeddings(x_c, w_a, b_a, force_pallas=True))
    assert out_c.shape == (4, 5, F_a, D_a)
    assert jnp.allclose(out_c, reference(x_c, w_a, b_a), atol=1e-6, rtol=1e-6)

    # --- D: larger F exercises the feature-tiled (multi-F-block) path -------
    F_d, D_d = 80, 32
    w_d, b_d = init_params(k6, k7, F_d, D_d)
    x_d = jax.random.normal(k3, (64, F_d), jnp.float32)
    out_d = jax.block_until_ready(linear_relu_embeddings(x_d, w_d, b_d))
    assert out_d.shape == (64, F_d, D_d)
    assert jnp.allclose(out_d, reference(x_d, w_d, b_d), atol=1e-5, rtol=1e-5)

    # --- E: bf16 inputs exercise the in-kernel casts / bf16 MXU path --------
    x_e = jax.random.normal(k3, (16, F_b), jnp.float32).astype(jnp.bfloat16)
    w_e, b_e = w_b.astype(jnp.bfloat16), b_b.astype(jnp.bfloat16)
    out_e = jax.block_until_ready(
        linear_relu_embeddings(x_e, w_e, b_e, force_pallas=True))
    assert out_e.shape == (16, F_b, D_b)
    ref_e = reference(x_e, w_e, b_e)
    assert jnp.allclose(out_e.astype(jnp.float32), ref_e, atol=1e-2, rtol=1e-2)

    print("KERNEL_OK")
</pallas_src>

<mosaic_0001>
module attributes {stable_mosaic.version = 11 : i64} {
  func.func @_linear_relu_emb_kernel(%arg0: i32, %arg1: i32, %arg2: memref<1x2x4xf32, #tpu.memory_space<vmem>>, %arg3: memref<4x128xf32, #tpu.memory_space<vmem>>, %arg4: memref<1x128xf32, #tpu.memory_space<vmem>>, %arg5: memref<1x128xf32, #tpu.memory_space<vmem>>, %arg6: memref<2x128xf32, #tpu.memory_space<vmem>>) attributes {dimension_semantics = [#tpu.dimension_semantics<parallel>, #tpu.dimension_semantics<parallel>], iteration_bounds = array<i64: 1, 1>, scalar_prefetch = 0 : i64, scratch_operands = 0 : i64, tpu.core_type = #tpu.core_type<tc>, window_params = [{transform_indices = @transform_0, window_bounds = array<i64: 1, 2, 4>}, {pipeline_mode = #tpu.pipeline_mode<synchronous>, transform_indices = @transform_1, window_bounds = array<i64: 4, 128>}, {transform_indices = @transform_2, window_bounds = array<i64: 1, 128>}, {transform_indices = @transform_3, window_bounds = array<i64: 1, 128>}, {transform_indices = @transform_4, window_bounds = array<i64: 2, 128>}]} {
    %c0 = arith.constant 0 : index
    %c0_0 = arith.constant 0 : index
    %c0_1 = arith.constant 0 : index
    %0 = vector.load %arg2[%c0, %c0_0, %c0_1] : memref<1x2x4xf32, #tpu.memory_space<vmem>>, vector<1x2x4xf32>
    %1 = vector.shape_cast %0 : vector<1x2x4xf32> to vector<2x4xf32>
    %c0_2 = arith.constant 0 : index
    %c0_3 = arith.constant 0 : index
    %2 = vector.load %arg3[%c0_2, %c0_3] : memref<4x128xf32, #tpu.memory_space<vmem>>, vector<4x128xf32>
    %cst = arith.constant dense<0.000000e+00> : vector<2x128xf32>
    %3 = tpu.matmul %1, %2, %cst {dimension_numbers = #tpu.dot_dimension_numbers<[1], [0], [0], [1], [0, 0, 1, 1], [], []>} : vector<2x4xf32>, vector<4x128xf32>, vector<2x128xf32> -> vector<2x128xf32>
    %c0_4 = arith.constant 0 : index
    %c0_5 = arith.constant 0 : index
    %4 = vector.load %arg4[%c0_4, %c0_5] : memref<1x128xf32, #tpu.memory_space<vmem>>, vector<1x128xf32>
    %c0_6 = arith.constant 0 : index
    %c0_7 = arith.constant 0 : index
    %5 = vector.load %arg5[%c0_6, %c0_7] : memref<1x128xf32, #tpu.memory_space<vmem>>, vector<1x128xf32>
    %6 = vector.broadcast %4 : vector<1x128xf32> to vector<2x128xf32>
    %7 = arith.mulf %6, %3 : vector<2x128xf32>
    %8 = vector.broadcast %5 : vector<1x128xf32> to vector<2x128xf32>
    %9 = arith.addf %8, %7 : vector<2x128xf32>
    %cst_8 = arith.constant 0.000000e+00 : f32
    %10 = vector.broadcast %cst_8 : f32 to vector<2x128xf32>
    %11 = arith.maximumf %9, %10 : vector<2x128xf32>
    %c0_9 = arith.constant 0 : index
    %c0_10 = arith.constant 0 : index
    %12 = vector.load %arg6[%c0_9, %c0_10] : memref<2x128xf32, #tpu.memory_space<vmem>>, vector<2x128xf32>
    tpu.vector_store %arg6[%c0_9, %c0_10], %11 {strides = array<i32>} : memref<2x128xf32, #tpu.memory_space<vmem>>, vector<2x128xf32>,
    return
  }
  func.func @transform_0(%arg0: i32, %arg1: i32) -> (i32, i32, i32) {
    %c0_i32 = arith.constant 0 : i32
    %c0_i32_0 = arith.constant 0 : i32
    return %arg1, %arg0, %c0_i32 : i32, i32, i32
  }
  func.func @transform_1(%arg0: i32, %arg1: i32) -> (i32, i32) {
    %c0_i32 = arith.constant 0 : i32
    %c0_i32_0 = arith.constant 0 : i32
    %c0_i32_1 = arith.constant 0 : i32
    return %c0_i32, %c0_i32_0 : i32, i32
  }
  func.func @transform_2(%arg0: i32, %arg1: i32) -> (i32, i32) {
    %c0_i32 = arith.constant 0 : i32
    %c0_i32_0 = arith.constant 0 : i32
    return %c0_i32, %arg1 : i32, i32
  }
  func.func @transform_3(%arg0: i32, %arg1: i32) -> (i32, i32) {
    %c0_i32 = arith.constant 0 : i32
    %c0_i32_0 = arith.constant 0 : i32
    return %c0_i32, %arg1 : i32, i32
  }
  func.func @transform_4(%arg0: i32, %arg1: i32) -> (i32, i32) {
    %c0_i32 = arith.constant 0 : i32
    return %arg0, %arg1 : i32, i32
  }
}

</mosaic_0001>

<bundles_post_ra>
// kernel: tpu_custom_call.1
= control target key start
LH: loop header
LB: loop body
LE: loop exit
PB: predicated region body
PF: predicated region fallthrough
CT: control target
= control target key end

     0   :  { %9 = vsyncpa [#allocation3], 0  ;;  %s234_s0 = inlined_call_operand.hbm [shape: f32[1,2,4], index: 0, kind: input, shape index: {}]   ;;  %s235_s1 = inlined_call_operand.hbm [shape: f32[4,128], index: 1, kind: input, shape index: {}]   ;;  %s236_s2 = inlined_call_operand.vmem [shape: f32[1,128], index: 2, kind: input, shape index: {}]   ;;  %s237_s3 = inlined_call_operand.vmem [shape: f32[1,128], index: 3, kind: input, shape index: {}]   ;;  %s238_s4 = inlined_call_operand.hbm [shape: f32[2,96], index: 4, kind: output, shape index: {}]  }
   0x1   :  { %10 = vsyncpa [#allocation6], 0 }
   0x2   :  { %11 = vsyncpa [#allocation4], 0  ;;  %s17_s17 = sshll.u32 %s234_s0, 4  ;;  %s191_s18 = smov [#allocation2]   ;;  %s18_s17 = int_to_ptr.hbm [resolvable:$true] %s17_s17 }
   0x3   :  { %s19_s19 = sshll.u32 %s191_s18, 4  ;;  %s28_s22 = sshll.u32 %s235_s1, 4  ;;  %s20_s19 = int_to_ptr.vmem [resolvable:$true] %s19_s19  ;;  %s29_s22 = int_to_ptr.hbm [resolvable:$true] %s28_s22 }
   0x4   :  { %22 = dma.hbm_to_vmem [thread:$0]  %s18_s17, 32, %s20_s19, [#allocation3]  }
   0x5   :  { %s192_s23 = smov [#allocation5]  }
   0x6   :  { %s30_s24 = sshll.u32 %s192_s23, 4  ;;  %s31_s24 = int_to_ptr.vmem [resolvable:$true] %s30_s24 }
   0x7   :  { %33 = dma.hbm_to_vmem [thread:$0]  %s29_s22, 64, %s31_s24, [#allocation6]  }
   0x8   :  { %185 = dma.done.wait [#allocation3], 32  }
   0x9   :  { %186 = vsyncadd [#allocation3], 4294967264 }
   0xa   :  { %187 = dma.done.wait [#allocation6], 64  }
   0xb   :  { %188 = vsyncadd [#allocation6], 4294967232  ;;  %vm52_vm0 = vcmask 1043456   ;;  %vm48_vm1 = vcmask 31744   ;;  %v47_v0 = vld [vmem:[#allocation5] sm:$0xf] }
   0xc   :  { %v46_v1 = vld [vmem:[#allocation2] sm:$0x3]  ;;  %106 = vmatpush.msk.msra.mxu0 %vm52_vm0, %v47_v0  ;;  %s193_s27 = smov [#allocation7]   ;;  %s95_s5 = sshll.u32 %s238_s4, 4  ;;  %s96_s5 = int_to_ptr.hbm [resolvable:$true] %s95_s5 }
   0xd   :  { %107 = vmatmul.msk.f32.vlgmr.msra.gmra.mxu0 %vm48_vm1, %v46_v1  ;;  %v111_v2 = vld [vmem:[%s236_s2] ss:$0 sm:$0xff]  ;;  %s93_s28 = sshll.u32 %s193_s27, 4  ;;  %s94_s28 = int_to_ptr.vmem [resolvable:$true] %s93_s28 }
   0xe   :  { %v112_v3 = vld [vmem:[%s237_s3] ss:$0 sm:$0xff] }
  0x8a   :  { %v73_v4 = vpop.f32.mrf.mxu0 }
  0x8b   :  { %v81_v5 = vmul.f32 %v111_v2, %v73_v4 }
  0x8d   :  { %v85_v6 = vadd.f32 %v112_v3, %v81_v5 }
  0x8f   :  { %v86_v7 = vmax.f32 %v85_v6, 0.0 }
  0x91   :  { %87 = vst [vmem:[#allocation7] sm:$0x3] %v86_v7 }
  0x92   :  { %98 = dma.vmem_to_hbm [thread:$0]  %s94_s28, 32, %s96_s5, [#allocation4]  }
  0x93   :  { %189 = dma.done.wait [#allocation4], 32  }
  0x94   :  { %190 = vsyncadd [#allocation4], 4294967264 }
  0x95   :  { %103 = vsyncpa [#allocation3], 1 }
  0x96   :  { %104 = vsyncpa [#allocation6], 1 }
  0x97   :  { %105 = vsyncpa [#allocation4], 1 }

</bundles_post_ra>
